<compile_context>
chip_gen: v5e
topology: v5e:2x2
jax: 0.10.0
libtpu: 0.0.40
codegen_flags: <defaults>
</compile_context>

<pallas_src>
import jax
import jax.numpy as jnp
from jax.experimental import pallas as pl
from jax.experimental.pallas import tpu as pltpu

SUBLANE = 8
MAX_TILE_B = 1024     # amortises the ~0.35 us per-grid-step overhead
MIN_SPLIT_B = 256     # force >=2 batch tiles above this (v7x megacore)


def _round_up(x, m):
    return (x + m - 1) // m * m


def _cdiv(a, b):
    return -(-a // b)


def _leaky_relu(x, slope=0.1):
    return jnp.where(x > 0, x, slope * x)


def _choose_tiling(batch):
    """Pick (tile_b, b_pad): minimal padding; >=2 tiles for large batches."""
    num_tiles = max(1, _cdiv(batch, MAX_TILE_B))
    if batch >= MIN_SPLIT_B:
        num_tiles = max(num_tiles, 2)
    tile_b = _round_up(_cdiv(batch, num_tiles), SUBLANE)
    return tile_b, num_tiles * tile_b


def _disc_kernel(x_ref, w1_ref, b1_ref, w2_ref, b2_ref, w3_ref, b3_ref,
                 out_ref):
    # x: (TILE_B, D) f32, cast to bf16 in-kernel (spare VPU slots).
    # Weights bf16 (MXU-native); bias-add / LeakyReLU epilogues stay f32.
    x = x_ref[...].astype(jnp.bfloat16)

    h1 = jnp.dot(x, w1_ref[...], preferred_element_type=jnp.float32)
    h1 = _leaky_relu(h1 + b1_ref[...]).astype(jnp.bfloat16)    # (TILE_B, 512)

    h2 = jnp.dot(h1, w2_ref[...], preferred_element_type=jnp.float32)
    h2 = _leaky_relu(h2 + b2_ref[...])                         # (TILE_B, 256) f32

    # Final 256 -> 1 layer as a VPU multiply + lane reduction in f32; the
    # (TILE_B, 1) store is only a handful of masked vst's per tile.
    logit = jnp.sum(h2 * w3_ref[...], axis=-1, keepdims=True)
    out_ref[...] = logit + b3_ref[...]                         # (TILE_B, 1) f32


def prepare_params(params):
    """One-time weight prep (bf16 casts / reshapes), hoisted out of forward."""
    return {
        "w1": params["w1"].astype(jnp.bfloat16),                # (D, 512)
        "b1": params["b1"].reshape(1, -1).astype(jnp.float32),  # (1, 512)
        "w2": params["w2"].astype(jnp.bfloat16),                # (512, 256)
        "b2": params["b2"].reshape(1, -1).astype(jnp.float32),  # (1, 256)
        "w3": params["w3"].reshape(1, -1).astype(jnp.float32),  # (1, 256) row
        "b3": params["b3"].reshape(1, 1).astype(jnp.float32),   # (1, 1)
    }


@jax.jit
def discriminator_forward(img, prepped):
    """img: (B, C, 1, W) float32. Returns (B, 1) float32 validity scores."""
    B = img.shape[0]
    x = img.reshape(B, -1).astype(jnp.float32)                  # PyTorch .view(B, -1)
    D = x.shape[1]
    H1 = prepped["w1"].shape[1]
    H2 = prepped["w2"].shape[1]

    tile_b, b_pad = _choose_tiling(B)
    if b_pad != B:
        x = jnp.pad(x, ((0, b_pad - B), (0, 0)))

    const = lambda i: (0, 0)                                    # weights VMEM-resident
    out = pl.pallas_call(
        _disc_kernel,
        out_shape=jax.ShapeDtypeStruct((b_pad, 1), jnp.float32),
        grid=(b_pad // tile_b,),
        in_specs=[
            pl.BlockSpec((tile_b, D), lambda i: (i, 0)),        # x: pipelined
            pl.BlockSpec((D, H1), const),
            pl.BlockSpec((1, H1), const),
            pl.BlockSpec((H1, H2), const),
            pl.BlockSpec((1, H2), const),
            pl.BlockSpec((1, H2), const),
            pl.BlockSpec((1, 1), const),
        ],
        out_specs=pl.BlockSpec((tile_b, 1), lambda i: (i, 0)),
        compiler_params=pltpu.CompilerParams(
            dimension_semantics=("parallel",)),                 # megacore on v7x
    )(x, prepped["w1"], prepped["b1"], prepped["w2"], prepped["b2"],
      prepped["w3"], prepped["b3"])

    return out[:B]


def init_params(key, in_dim):
    """Deterministic synthetic init (PyTorch-Linear-like uniform bounds)."""
    ks = jax.random.split(key, 6)

    def linear(kw, kb, fan_in, fan_out):
        bound = 1.0 / jnp.sqrt(jnp.float32(fan_in))
        w = jax.random.uniform(kw, (fan_in, fan_out), jnp.float32, -bound, bound)
        b = jax.random.uniform(kb, (1, fan_out), jnp.float32, -bound, bound)
        return w, b

    w1, b1 = linear(ks[0], ks[1], in_dim, 512)
    w2, b2 = linear(ks[2], ks[3], 512, 256)
    w3, b3 = linear(ks[4], ks[5], 256, 1)
    return {"w1": w1, "b1": b1, "w2": w2, "b2": b2, "w3": w3, "b3": b3}


def _ref_forward(img, params):
    """Plain-JAX reference mirroring the kernel's bf16 rounding (layers 1-2)."""
    bf = lambda a: a.astype(jnp.bfloat16).astype(jnp.float32)
    x = img.reshape(img.shape[0], -1).astype(jnp.float32)
    h1 = _leaky_relu(bf(x) @ bf(params["w1"]) + params["b1"])
    h2 = _leaky_relu(bf(h1) @ bf(params["w2"]) + params["b2"])
    return h2 @ params["w3"] + params["b3"]


if __name__ == "__main__":
    # img_shape = (channels, 1, img_size) -> channels=4, img_size=16
    B, C, H, W = 2, 4, 1, 16
    in_dim = C * H * W

    key = jax.random.PRNGKey(0)
    k_img, k_par = jax.random.split(key)

    img = jax.random.normal(k_img, (B, C, H, W), dtype=jnp.float32)
    params = init_params(k_par, in_dim)
    prepped = prepare_params(params)            # one-time weight prep

    out = discriminator_forward(img, prepped)
    jax.block_until_ready(out)

    ref = _ref_forward(img, params)
    assert out.shape == (B, 1)
    assert jnp.allclose(out, ref, atol=2e-2, rtol=2e-2), (out, ref)

    print("KERNEL_OK")
</pallas_src>

<mosaic_0001>
module attributes {stable_mosaic.version = 11 : i64} {
  func.func @_disc_kernel(%arg0: i32, %arg1: memref<8x64xf32, #tpu.memory_space<vmem>>, %arg2: memref<64x512xbf16, #tpu.memory_space<vmem>>, %arg3: memref<1x512xf32, #tpu.memory_space<vmem>>, %arg4: memref<512x256xbf16, #tpu.memory_space<vmem>>, %arg5: memref<1x256xf32, #tpu.memory_space<vmem>>, %arg6: memref<1x256xf32, #tpu.memory_space<vmem>>, %arg7: memref<1x1xf32, #tpu.memory_space<vmem>>, %arg8: memref<8x1xf32, #tpu.memory_space<vmem>>) attributes {dimension_semantics = [#tpu.dimension_semantics<parallel>], iteration_bounds = array<i64: 1>, scalar_prefetch = 0 : i64, scratch_operands = 0 : i64, tpu.core_type = #tpu.core_type<tc>, window_params = [{transform_indices = @transform_0, window_bounds = array<i64: 8, 64>}, {pipeline_mode = #tpu.pipeline_mode<synchronous>, transform_indices = @transform_1, window_bounds = array<i64: 64, 512>}, {pipeline_mode = #tpu.pipeline_mode<synchronous>, transform_indices = @transform_2, window_bounds = array<i64: 1, 512>}, {pipeline_mode = #tpu.pipeline_mode<synchronous>, transform_indices = @transform_3, window_bounds = array<i64: 512, 256>}, {pipeline_mode = #tpu.pipeline_mode<synchronous>, transform_indices = @transform_4, window_bounds = array<i64: 1, 256>}, {pipeline_mode = #tpu.pipeline_mode<synchronous>, transform_indices = @transform_5, window_bounds = array<i64: 1, 256>}, {pipeline_mode = #tpu.pipeline_mode<synchronous>, transform_indices = @transform_6, window_bounds = array<i64: 1, 1>}, {transform_indices = @transform_7, window_bounds = array<i64: 8, 1>}]} {
    %c0 = arith.constant 0 : index
    %c0_0 = arith.constant 0 : index
    %0 = vector.load %arg1[%c0, %c0_0] : memref<8x64xf32, #tpu.memory_space<vmem>>, vector<8x64xf32>
    %1 = arith.truncf %0 : vector<8x64xf32> to vector<8x64xbf16>
    %c0_1 = arith.constant 0 : index
    %c0_2 = arith.constant 0 : index
    %2 = vector.load %arg2[%c0_1, %c0_2] : memref<64x512xbf16, #tpu.memory_space<vmem>>, vector<64x512xbf16>
    %cst = arith.constant dense<0.000000e+00> : vector<8x512xf32>
    %3 = tpu.matmul %1, %2, %cst {dimension_numbers = #tpu.dot_dimension_numbers<[1], [0], [0], [1], [0, 0, 1, 1], [], []>} : vector<8x64xbf16>, vector<64x512xbf16>, vector<8x512xf32> -> vector<8x512xf32>
    %c0_3 = arith.constant 0 : index
    %c0_4 = arith.constant 0 : index
    %4 = vector.load %arg3[%c0_3, %c0_4] : memref<1x512xf32, #tpu.memory_space<vmem>>, vector<1x512xf32>
    %5 = vector.broadcast %4 : vector<1x512xf32> to vector<8x512xf32>
    %6 = arith.addf %3, %5 : vector<8x512xf32>
    %cst_5 = arith.constant 0.000000e+00 : f32
    %7 = vector.broadcast %cst_5 : f32 to vector<8x512xf32>
    %8 = arith.cmpf ogt, %6, %7 : vector<8x512xf32>
    %cst_6 = arith.constant 1.000000e-01 : f32
    %9 = vector.broadcast %cst_6 : f32 to vector<8x512xf32>
    %10 = arith.mulf %9, %6 : vector<8x512xf32>
    %11 = arith.select %8, %6, %10 : vector<8x512xi1>, vector<8x512xf32>
    %12 = arith.truncf %11 : vector<8x512xf32> to vector<8x512xbf16>
    %c0_7 = arith.constant 0 : index
    %c0_8 = arith.constant 0 : index
    %13 = vector.load %arg4[%c0_7, %c0_8] : memref<512x256xbf16, #tpu.memory_space<vmem>>, vector<512x256xbf16>
    %cst_9 = arith.constant dense<0.000000e+00> : vector<8x256xf32>
    %14 = tpu.matmul %12, %13, %cst_9 {dimension_numbers = #tpu.dot_dimension_numbers<[1], [0], [0], [1], [0, 0, 1, 1], [], []>} : vector<8x512xbf16>, vector<512x256xbf16>, vector<8x256xf32> -> vector<8x256xf32>
    %c0_10 = arith.constant 0 : index
    %c0_11 = arith.constant 0 : index
    %15 = vector.load %arg5[%c0_10, %c0_11] : memref<1x256xf32, #tpu.memory_space<vmem>>, vector<1x256xf32>
    %16 = vector.broadcast %15 : vector<1x256xf32> to vector<8x256xf32>
    %17 = arith.addf %14, %16 : vector<8x256xf32>
    %cst_12 = arith.constant 0.000000e+00 : f32
    %18 = vector.broadcast %cst_12 : f32 to vector<8x256xf32>
    %19 = arith.cmpf ogt, %17, %18 : vector<8x256xf32>
    %cst_13 = arith.constant 1.000000e-01 : f32
    %20 = vector.broadcast %cst_13 : f32 to vector<8x256xf32>
    %21 = arith.mulf %20, %17 : vector<8x256xf32>
    %22 = arith.select %19, %17, %21 : vector<8x256xi1>, vector<8x256xf32>
    %c0_14 = arith.constant 0 : index
    %c0_15 = arith.constant 0 : index
    %23 = vector.load %arg6[%c0_14, %c0_15] : memref<1x256xf32, #tpu.memory_space<vmem>>, vector<1x256xf32>
    %24 = vector.broadcast %23 : vector<1x256xf32> to vector<8x256xf32>
    %25 = arith.mulf %22, %24 : vector<8x256xf32>
    %cst_16 = arith.constant dense<0.000000e+00> : vector<8xf32>
    %26 = vector.multi_reduction <add>, %25, %cst_16 [1] : vector<8x256xf32> to vector<8xf32>
    %27 = vector.shape_cast %26 : vector<8xf32> to vector<8x1xf32>
    %c0_17 = arith.constant 0 : index
    %c0_18 = arith.constant 0 : index
    %28 = vector.load %arg7[%c0_17, %c0_18] : memref<1x1xf32, #tpu.memory_space<vmem>>, vector<1x1xf32>
    %29 = vector.broadcast %28 : vector<1x1xf32> to vector<8x1xf32>
    %30 = arith.addf %27, %29 : vector<8x1xf32>
    %c0_19 = arith.constant 0 : index
    %c0_20 = arith.constant 0 : index
    %31 = vector.load %arg8[%c0_19, %c0_20] : memref<8x1xf32, #tpu.memory_space<vmem>>, vector<8x1xf32>
    tpu.vector_store %arg8[%c0_19, %c0_20], %30 {strides = array<i32>} : memref<8x1xf32, #tpu.memory_space<vmem>>, vector<8x1xf32>,
    return
  }
  func.func @transform_0(%arg0: i32) -> (i32, i32) {
    %c0_i32 = arith.constant 0 : i32
    %c0_i32_0 = arith.constant 0 : i32
    return %arg0, %c0_i32 : i32, i32
  }
  func.func @transform_1(%arg0: i32) -> (i32, i32) {
    %c0_i32 = arith.constant 0 : i32
    %c0_i32_0 = arith.constant 0 : i32
    %c0_i32_1 = arith.constant 0 : i32
    return %c0_i32, %c0_i32_0 : i32, i32
  }
  func.func @transform_2(%arg0: i32) -> (i32, i32) {
    %c0_i32 = arith.constant 0 : i32
    %c0_i32_0 = arith.constant 0 : i32
    %c0_i32_1 = arith.constant 0 : i32
    return %c0_i32, %c0_i32_0 : i32, i32
  }
  func.func @transform_3(%arg0: i32) -> (i32, i32) {
    %c0_i32 = arith.constant 0 : i32
    %c0_i32_0 = arith.constant 0 : i32
    %c0_i32_1 = arith.constant 0 : i32
    return %c0_i32, %c0_i32_0 : i32, i32
  }
  func.func @transform_4(%arg0: i32) -> (i32, i32) {
    %c0_i32 = arith.constant 0 : i32
    %c0_i32_0 = arith.constant 0 : i32
    %c0_i32_1 = arith.constant 0 : i32
    return %c0_i32, %c0_i32_0 : i32, i32
  }
  func.func @transform_5(%arg0: i32) -> (i32, i32) {
    %c0_i32 = arith.constant 0 : i32
    %c0_i32_0 = arith.constant 0 : i32
    %c0_i32_1 = arith.constant 0 : i32
    return %c0_i32, %c0_i32_0 : i32, i32
  }
  func.func @transform_6(%arg0: i32) -> (i32, i32) {
    %c0_i32 = arith.constant 0 : i32
    %c0_i32_0 = arith.constant 0 : i32
    %c0_i32_1 = arith.constant 0 : i32
    return %c0_i32, %c0_i32_0 : i32, i32
  }
  func.func @transform_7(%arg0: i32) -> (i32, i32) {
    %c0_i32 = arith.constant 0 : i32
    %c0_i32_0 = arith.constant 0 : i32
    return %arg0, %c0_i32 : i32, i32
  }
}

</mosaic_0001>

<bundles_post_ra>
// kernel: discriminator_forward.1
= control target key start
LH: loop header
LB: loop body
LE: loop exit
PB: predicated region body
PF: predicated region fallthrough
CT: control target
= control target key end

     0   :  { %s1302_s0 = inlined_call_operand.vmem [shape: f32[8,64], index: 0, kind: input, shape index: {}]   ;;  %s1303_s1 = inlined_call_operand.hbm [shape: bf16[64,512], index: 1, kind: input, shape index: {}]   ;;  %s1304_s2 = inlined_call_operand.vmem [shape: f32[1,512], index: 2, kind: input, shape index: {}]   ;;  %s1305_s3 = inlined_call_operand.hbm [shape: bf16[512,256], index: 3, kind: input, shape index: {}]   ;;  %s1306_s4 = inlined_call_operand.vmem [shape: f32[1,256], index: 4, kind: input, shape index: {}]   ;;  %s1307_s5 = inlined_call_operand.vmem [shape: f32[1,256], index: 5, kind: input, shape index: {}]   ;;  %s1308_s6 = inlined_call_operand.<no memory space> [shape: f32[1,1], index: 6, kind: input, shape index: {}]   ;;  %s1309_s7 = inlined_call_operand.vmem [shape: f32[8,1], index: 7, kind: output, shape index: {}]  }
   0x1   :  { %v12_v0 = vstv %s1308_s6 }
   0x2   :  { %13 = vst [vmem:[#allocation2] sm:$0x1] %v12_v0 }
   0x3   :  { %14 = vsyncpa [#allocation4], 0  ;;  %s22_s28 = sshll.u32 %s1303_s1, 4  ;;  %s23_s28 = int_to_ptr.hbm [resolvable:$true] %s22_s28 }
   0x4   :  { %15 = vsyncpa [#allocation6], 0  ;;  %s1228_s29 = smov [#allocation3]   ;;  %s37_s10 = sshll.u32 %s1305_s3, 4  ;;  %s38_s10 = int_to_ptr.hbm [resolvable:$true] %s37_s10 }
   0x5   :  { %s24_s30 = sshll.u32 %s1228_s29, 4  ;;  %s1229_s11 = smov 256   ;;  %s25_s30 = int_to_ptr.vmem [resolvable:$true] %s24_s30 }
   0x6   :  { %s1230_s12 = smov 16   ;;  %s1231_s6 = smov [#allocation5]  }
   0x7   :  { %30 = dma.hbm_to_vmem [thread:$0]  %s23_s28, 2048, %s25_s30, [#allocation4], %s1229_s11, %s1229_s11, %s1230_s12  }
   0x8   :  { %s39_s13 = sshll.u32 %s1231_s6, 4  ;;  %s1232_s14 = smov 128   ;;  %s40_s13 = int_to_ptr.vmem [resolvable:$true] %s39_s13 }
   0x9   :  { %s1233_s15 = smov 8  }
   0xa   :  { %45 = dma.hbm_to_vmem [thread:$0]  %s38_s10, 8192, %s40_s13, [#allocation6], %s1232_s14, %s1232_s14, %s1233_s15  }
   0xb   :  { %1224 = dma.done.wait [#allocation4], 2048  }
   0xc   :  { %1225 = vsyncadd [#allocation4], 4294965248 }
   0xd   :  { %1226 = dma.done.wait [#allocation6], 8192  }
   0xe   :  { %1227 = vsyncadd [#allocation6], 4294959104  ;;  %v815_v1 = vld [vmem:[#allocation3 + $0x60] sm:$0xf]  ;;  %v1103_v2 = vld [vmem:[#allocation3 + $0x6c] sm:$0xf0] }
   0xf   :  { %v1101_v3 = vld [vmem:[#allocation3 + $0x64] sm:$0xf]  ;;  %v816_v4 = vor.u32 %v1103_v2, %v815_v1  ;;  %v817_v5 = vld [vmem:[#allocation3 + $0x70] sm:$0xf0]  ;;  %v823_v6 = vld [vmem:[#allocation3 + $0x68] sm:$0xf] }
  0x10   :  { %v1104_v7 = vld [vmem:[#allocation3 + $0x74] sm:$0xf0]  ;;  %v820_v8 = vor.u32 %v1101_v3, %v817_v5  ;;  %v1102_v10 = vld [vmem:[#allocation3 + $0x6c] sm:$0xf]  ;;  %v825_v11 = vld [vmem:[#allocation3 + $0x78] sm:$0xf0] }
  0x11   :  { %v824_v9 = vor.u32 %v1104_v7, %v823_v6  ;;  %v799_v12 = vld [vmem:[#allocation3 + $0x40] sm:$0xf]  ;;  %177 = vmatpush.bf16.msra.mxu0 %v816_v4  ;;  %v828_v13 = vor.u32 %v1102_v10, %v825_v11  ;;  %v1099_v14 = vld [vmem:[#allocation3 + $0x4c] sm:$0xf0]  ;;  %v1097_v15 = vld [vmem:[#allocation3 + $0x44] sm:$0xf] }
  0x12   :  { %v801_v16 = vld [vmem:[#allocation3 + $0x50] sm:$0xf0]  ;;  %190 = vmatpush.bf16.msra.mxu1 %v820_v8  ;;  %v800_v17 = vor.u32 %v1099_v14, %v799_v12  ;;  %v807_v19 = vld [vmem:[#allocation3 + $0x48] sm:$0xf]  ;;  %v1100_v20 = vld [vmem:[#allocation3 + $0x54] sm:$0xf0] }
  0x13   :  { %203 = vmatpush.bf16.msra.mxu2 %v824_v9  ;;  %v804_v18 = vor.u32 %v1097_v15, %v801_v16  ;;  %v1098_v21 = vld [vmem:[#allocation3 + $0x4c] sm:$0xf]  ;;  %216 = vmatpush.bf16.msra.mxu3 %v828_v13  ;;  %v808_v22 = vor.u32 %v1100_v20, %v807_v19  ;;  %v809_v23 = vld [vmem:[#allocation3 + $0x58] sm:$0xf0]  ;;  %v783_v24 = vld [vmem:[#allocation3 + $0x20] sm:$0xf] }
  0x14   :  { %v1095_v25 = vld [vmem:[#allocation3 + $0x2c] sm:$0xf0]  ;;  %v812_v26 = vor.u32 %v1098_v21, %v809_v23  ;;  %v1093_v27 = vld [vmem:[#allocation3 + $0x24] sm:$0xf]  ;;  %v785_v28 = vld [vmem:[#allocation3 + $0x30] sm:$0xf0] }
  0x15   :  { %v791_v29 = vld [vmem:[#allocation3 + $0x28] sm:$0xf]  ;;  %178 = vmatpush.bf16.msra.mxu0 %v800_v17  ;;  %v784_v30 = vor.u32 %v1095_v25, %v783_v24  ;;  %v1096_v31 = vld [vmem:[#allocation3 + $0x34] sm:$0xf0]  ;;  %v1094_v32 = vld [vmem:[#allocation3 + $0x2c] sm:$0xf]  ;;  %v788_v34 = vor.u32 %v1093_v27, %v785_v28 }
  0x16   :  { %v793_v33 = vld [vmem:[#allocation3 + $0x38] sm:$0xf0]  ;;  %191 = vmatpush.bf16.msra.mxu1 %v804_v18  ;;  %v792_v35 = vor.u32 %v1096_v31, %v791_v29  ;;  %v767_v36 = vld [vmem:[#allocation3] sm:$0xf]  ;;  %v1091_v37 = vld [vmem:[#allocation3 + $0xc] sm:$0xf0] }
  0x17   :  { %204 = vmatpush.bf16.msra.mxu2 %v808_v22  ;;  %v1089_v38 = vld [vmem:[#allocation3 + $0x4] sm:$0xf]  ;;  %217 = vmatpush.bf16.msra.mxu3 %v812_v26  ;;  %v796_v39 = vor.u32 %v1094_v32, %v793_v33  ;;  %v769_v40 = vld [vmem:[#allocation3 + $0x10] sm:$0xf0]  ;;  %v775_v41 = vld [vmem:[#allocation3 + $0x8] sm:$0xf]  ;;  %v768_v46 = vor.u32 %v1091_v37, %v767_v36 }
  0x18   :  { %v1092_v42 = vld [vmem:[#allocation3 + $0x14] sm:$0xf0]  ;;  %v1090_v43 = vld [vmem:[#allocation3 + $0xc] sm:$0xf]  ;;  %v777_v44 = vld [vmem:[#allocation3 + $0x18] sm:$0xf0]  ;;  %v772_v50 = vor.u32 %v1089_v38, %v769_v40 }
  0x19   :  { %v61_v45 = vld [vmem:[%s1302_s0] sm:$0xff]  ;;  %179 = vmatpush.bf16.msra.mxu0 %v784_v30  ;;  %v891_v47 = vld [vmem:[#allocation5 + $0x70] sm:$0xf]  ;;  %v1120_v48 = vld [vmem:[#allocation5 + $0x74] sm:$0xf0]  ;;  %v776_v51 = vor.u32 %v1092_v42, %v775_v41  ;;  %v780_v53 = vor.u32 %v1090_v43, %v777_v44  ;;  %vm169_vm0 = vcmask 523264  }
  0x1a   :  { %v955_v49 = vld [vmem:[#allocation5 + $0xf0] sm:$0xf]  ;;  %192 = vmatpush.bf16.msra.mxu1 %v788_v34  ;;  %v1136_v52 = vld [vmem:[#allocation5 + $0xf4] sm:$0xf0]  ;;  %v892_v54 = vor.u32 %v1120_v48, %v891_v47  ;;  %v883_v55 = vld [vmem:[#allocation5 + $0x60] sm:$0xf]  ;;  %v62_v58 = vpack.c.bf16 %v61_v45, %v61_v45 }
  0x1b   :  { %205 = vmatpush.bf16.msra.mxu2 %v792_v35  ;;  %218 = vmatpush.bf16.msra.mxu3 %v796_v39  ;;  %v1118_v56 = vld [vmem:[#allocation5 + $0x64] sm:$0xf0]  ;;  %v1019_v57 = vld [vmem:[#allocation5 + $0x170] sm:$0xf]  ;;  %v956_v59 = vor.u32 %v1136_v52, %v955_v49  ;;  %v1152_v60 = vld [vmem:[#allocation5 + $0x174] sm:$0xf0] }
  0x1c   :  { %v1083_v61 = vld [vmem:[#allocation5 + $0x1f0] sm:$0xf]  ;;  %v1168_v62 = vld [vmem:[#allocation5 + $0x1f4] sm:$0xf0]  ;;  %v947_v63 = vld [vmem:[#allocation5 + $0xe0] sm:$0xf]  ;;  %v1020_v1 = vor.u32 %v1152_v60, %v1019_v57  ;;  %v884_v2 = vor.u32 %v1118_v56, %v883_v55 }
  0x1d   :  { %180 = vmatpush.bf16.msra.mxu0 %v768_v46  ;;  %v1134_v0 = vld [vmem:[#allocation5 + $0xe4] sm:$0xf0]  ;;  %v1084_v3 = vor.u32 %v1168_v62, %v1083_v61  ;;  %v875_v4 = vld [vmem:[#allocation5 + $0x50] sm:$0xf]  ;;  %v1011_v5 = vld [vmem:[#allocation5 + $0x160] sm:$0xf] }
  0x1e   :  { %193 = vmatpush.bf16.msra.mxu1 %v772_v50  ;;  %v1150_v6 = vld [vmem:[#allocation5 + $0x164] sm:$0xf0]  ;;  %v948_v7 = vor.u32 %v1134_v0, %v947_v63  ;;  %v1116_v8 = vld [vmem:[#allocation5 + $0x54] sm:$0xf0]  ;;  %v1075_v9 = vld [vmem:[#allocation5 + $0x1e0] sm:$0xf] }
  0x1f   :  { %206 = vmatpush.bf16.msra.mxu2 %v776_v51  ;;  %219 = vmatpush.bf16.msra.mxu3 %v780_v53  ;;  %v1166_v10 = vld [vmem:[#allocation5 + $0x1e4] sm:$0xf0]  ;;  %v939_v11 = vld [vmem:[#allocation5 + $0xd0] sm:$0xf]  ;;  %v1132_v12 = vld [vmem:[#allocation5 + $0xd4] sm:$0xf0]  ;;  %v1012_v13 = vor.u32 %v1150_v6, %v1011_v5  ;;  %v876_v14 = vor.u32 %v1116_v8, %v875_v4 }
  0x20   :  { %829 = vmatmul.msk.bf16.vlgmr.msra.gmra.mxu0 %vm169_vm0, %v62_v58  ;;  %v1076_v15 = vor.u32 %v1166_v10, %v1075_v9  ;;  %v867_v16 = vld [vmem:[#allocation5 + $0x40] sm:$0xf]  ;;  %v1003_v17 = vld [vmem:[#allocation5 + $0x150] sm:$0xf]  ;;  %v1148_v18 = vld [vmem:[#allocation5 + $0x154] sm:$0xf0]  ;;  %v940_v19 = vor.u32 %v1132_v12, %v939_v11 }
  0x21   :  { %631 = vmatpush.bf16.msrb.mxu0 %v892_v54  ;;  %830 = vmatmul.msk.bf16.vlgmr.msra.gmra.mxu1 %vm169_vm0, %v62_v58  ;;  %v1114_v20 = vld [vmem:[#allocation5 + $0x44] sm:$0xf0]  ;;  %v1067_v21 = vld [vmem:[#allocation5 + $0x1d0] sm:$0xf]  ;;  %v1164_v22 = vld [vmem:[#allocation5 + $0x1d4] sm:$0xf0]  ;;  %v1004_v25 = vor.u32 %v1148_v18, %v1003_v17 }
  0x22   :  { %644 = vmatpush.bf16.msrb.mxu1 %v956_v59  ;;  %831 = vmatmul.msk.bf16.vlgmr.msra.gmra.mxu2 %vm169_vm0, %v62_v58  ;;  %v931_v23 = vld [vmem:[#allocation5 + $0xc0] sm:$0xf]  ;;  %v1130_v24 = vld [vmem:[#allocation5 + $0xc4] sm:$0xf0]  ;;  %v868_v26 = vor.u32 %v1114_v20, %v867_v16  ;;  %v1068_v27 = vor.u32 %v1164_v22, %v1067_v21  ;;  %v859_v28 = vld [vmem:[#allocation5 + $0x30] sm:$0xf] }
  0x23   :  { %832 = vmatmul.msk.bf16.vlgmr.msra.gmra.mxu3 %vm169_vm0, %v62_v58  ;;  %657 = vmatpush.bf16.msrb.mxu2 %v1020_v1  ;;  %v995_v29 = vld [vmem:[#allocation5 + $0x140] sm:$0xf]  ;;  %v1146_v30 = vld [vmem:[#allocation5 + $0x144] sm:$0xf0]  ;;  %v932_v31 = vor.u32 %v1130_v24, %v931_v23  ;;  %v1112_v32 = vld [vmem:[#allocation5 + $0x34] sm:$0xf0] }
  0x24   :  { %670 = vmatpush.bf16.msrb.mxu3 %v1084_v3  ;;  %v1059_v33 = vld [vmem:[#allocation5 + $0x1c0] sm:$0xf]  ;;  %v1162_v34 = vld [vmem:[#allocation5 + $0x1c4] sm:$0xf0]  ;;  %v923_v35 = vld [vmem:[#allocation5 + $0xb0] sm:$0xf]  ;;  %v996_v37 = vor.u32 %v1146_v30, %v995_v29  ;;  %v860_v38 = vor.u32 %v1112_v32, %v859_v28 }
  0x25   :  { %632 = vmatpush.bf16.msrb.mxu0 %v884_v2  ;;  %v1128_v36 = vld [vmem:[#allocation5 + $0xb4] sm:$0xf0]  ;;  %v1060_v39 = vor.u32 %v1162_v34, %v1059_v33  ;;  %v851_v40 = vld [vmem:[#allocation5 + $0x20] sm:$0xf]  ;;  %v987_v41 = vld [vmem:[#allocation5 + $0x130] sm:$0xf] }
  0x26   :  { %645 = vmatpush.bf16.msrb.mxu1 %v948_v7  ;;  %v1144_v42 = vld [vmem:[#allocation5 + $0x134] sm:$0xf0]  ;;  %v924_v43 = vor.u32 %v1128_v36, %v923_v35  ;;  %v1110_v44 = vld [vmem:[#allocation5 + $0x24] sm:$0xf0]  ;;  %v1051_v45 = vld [vmem:[#allocation5 + $0x1b0] sm:$0xf] }
  0x27   :  { %658 = vmatpush.bf16.msrb.mxu2 %v1012_v13  ;;  %v1160_v46 = vld [vmem:[#allocation5 + $0x1b4] sm:$0xf0]  ;;  %v915_v47 = vld [vmem:[#allocation5 + $0xa0] sm:$0xf]  ;;  %v1126_v48 = vld [vmem:[#allocation5 + $0xa4] sm:$0xf0]  ;;  %v988_v49 = vor.u32 %v1144_v42, %v987_v41  ;;  %v852_v50 = vor.u32 %v1110_v44, %v851_v40 }
  0x28   :  { %671 = vmatpush.bf16.msrb.mxu3 %v1076_v15  ;;  %v1052_v51 = vor.u32 %v1160_v46, %v1051_v45  ;;  %v843_v52 = vld [vmem:[#allocation5 + $0x10] sm:$0xf]  ;;  %v979_v53 = vld [vmem:[#allocation5 + $0x120] sm:$0xf]  ;;  %v1142_v54 = vld [vmem:[#allocation5 + $0x124] sm:$0xf0]  ;;  %v916_v55 = vor.u32 %v1126_v48, %v915_v47 }
  0x29   :  { %633 = vmatpush.bf16.msrb.mxu0 %v876_v14  ;;  %v1108_v56 = vld [vmem:[#allocation5 + $0x14] sm:$0xf0]  ;;  %v1043_v57 = vld [vmem:[#allocation5 + $0x1a0] sm:$0xf]  ;;  %v1158_v58 = vld [vmem:[#allocation5 + $0x1a4] sm:$0xf0]  ;;  %v980_v61 = vor.u32 %v1142_v54, %v979_v53 }
  0x2a   :  { %646 = vmatpush.bf16.msrb.mxu1 %v940_v19  ;;  %v907_v59 = vld [vmem:[#allocation5 + $0x90] sm:$0xf]  ;;  %v1124_v60 = vld [vmem:[#allocation5 + $0x94] sm:$0xf0]  ;;  %v835_v62 = vld [vmem:[#allocation5] sm:$0xf]  ;;  %v844_v63 = vor.u32 %v1108_v56, %v843_v52  ;;  %v1044_v0 = vor.u32 %v1158_v58, %v1043_v57 }
  0x2b   :  { %659 = vmatpush.bf16.msrb.mxu2 %v1004_v25  ;;  %v1106_v1 = vld [vmem:[#allocation5 + $0x4] sm:$0xf0]  ;;  %v971_v2 = vld [vmem:[#allocation5 + $0x110] sm:$0xf]  ;;  %v1140_v3 = vld [vmem:[#allocation5 + $0x114] sm:$0xf0]  ;;  %v908_v4 = vor.u32 %v1124_v60, %v907_v59 }
  0x2c   :  { %672 = vmatpush.bf16.msrb.mxu3 %v1068_v27  ;;  %v899_v5 = vld [vmem:[#allocation5 + $0x80] sm:$0xf]  ;;  %v1035_v6 = vld [vmem:[#allocation5 + $0x190] sm:$0xf]  ;;  %v1156_v7 = vld [vmem:[#allocation5 + $0x194] sm:$0xf0]  ;;  %v972_v13 = vor.u32 %v1140_v3, %v971_v2  ;;  %v836_v14 = vor.u32 %v1106_v1, %v835_v62 }
  0x2d   :  { %634 = vmatpush.bf16.msrb.mxu0 %v868_v26  ;;  %v1122_v8 = vld [vmem:[#allocation5 + $0x84] sm:$0xf0]  ;;  %v1119_v9 = vld [vmem:[#allocation5 + $0x74] sm:$0xf]  ;;  %v893_v10 = vld [vmem:[#allocation5 + $0x78] sm:$0xf0]  ;;  %v1036_v15 = vor.u32 %v1156_v7, %v1035_v6 }
  0x2e   :  { %647 = vmatpush.bf16.msrb.mxu1 %v932_v31  ;;  %v1135_v11 = vld [vmem:[#allocation5 + $0xf4] sm:$0xf]  ;;  %v957_v12 = vld [vmem:[#allocation5 + $0xf8] sm:$0xf0]  ;;  %v1117_v16 = vld [vmem:[#allocation5 + $0x64] sm:$0xf]  ;;  %v900_v20 = vor.u32 %v1122_v8, %v899_v5  ;;  %v896_v21 = vor.u32 %v1119_v9, %v893_v10 }
  0x2f   :  { %660 = vmatpush.bf16.msrb.mxu2 %v996_v37  ;;  %v963_v17 = vld [vmem:[#allocation5 + $0x100] sm:$0xf]  ;;  %v1138_v18 = vld [vmem:[#allocation5 + $0x104] sm:$0xf0]  ;;  %v1151_v23 = vld [vmem:[#allocation5 + $0x174] sm:$0xf]  ;;  %v960_v25 = vor.u32 %v1135_v11, %v957_v12 }
  0x30   :  { %673 = vmatpush.bf16.msrb.mxu3 %v1060_v39  ;;  %v1027_v19 = vld [vmem:[#allocation5 + $0x180] sm:$0xf]  ;;  %v1154_v22 = vld [vmem:[#allocation5 + $0x184] sm:$0xf0]  ;;  %v1021_v24 = vld [vmem:[#allocation5 + $0x178] sm:$0xf0]  ;;  %v964_v31 = vor.u32 %v1138_v18, %v963_v17 }
  0x31   :  { %635 = vmatpush.bf16.msrb.mxu0 %v860_v38  ;;  %v885_v26 = vld [vmem:[#allocation5 + $0x68] sm:$0xf0]  ;;  %v1167_v27 = vld [vmem:[#allocation5 + $0x1f4] sm:$0xf]  ;;  %v1085_v28 = vld [vmem:[#allocation5 + $0x1f8] sm:$0xf0]  ;;  %v1028_v32 = vor.u32 %v1154_v22, %v1027_v19  ;;  %v1024_v33 = vor.u32 %v1151_v23, %v1021_v24 }
  0x32   :  { %648 = vmatpush.bf16.msrb.mxu1 %v924_v43  ;;  %v1133_v29 = vld [vmem:[#allocation5 + $0xe4] sm:$0xf]  ;;  %v949_v30 = vld [vmem:[#allocation5 + $0xe8] sm:$0xf0]  ;;  %v888_v34 = vor.u32 %v1117_v16, %v885_v26  ;;  %v1088_v35 = vor.u32 %v1167_v27, %v1085_v28  ;;  %v1115_v37 = vld [vmem:[#allocation5 + $0x54] sm:$0xf] }
  0x33   :  { %661 = vmatpush.bf16.msrb.mxu2 %v988_v49  ;;  %v952_v36 = vor.u32 %v1133_v29, %v949_v30  ;;  %v877_v38 = vld [vmem:[#allocation5 + $0x58] sm:$0xf0]  ;;  %v1131_v39 = vld [vmem:[#allocation5 + $0xd4] sm:$0xf]  ;;  %v1149_v43 = vld [vmem:[#allocation5 + $0x164] sm:$0xf] }
  0x34   :  { %674 = vmatpush.bf16.msrb.mxu3 %v1052_v51  ;;  %v880_v40 = vor.u32 %v1115_v37, %v877_v38  ;;  %v941_v41 = vld [vmem:[#allocation5 + $0xd8] sm:$0xf0]  ;;  %v1013_v44 = vld [vmem:[#allocation5 + $0x168] sm:$0xf0]  ;;  %v1165_v45 = vld [vmem:[#allocation5 + $0x1e4] sm:$0xf] }
  0x35   :  { %636 = vmatpush.bf16.msrb.mxu0 %v852_v50  ;;  %v944_v42 = vor.u32 %v1131_v39, %v941_v41  ;;  %v1016_v46 = vor.u32 %v1149_v43, %v1013_v44  ;;  %v1077_v47 = vld [vmem:[#allocation5 + $0x1e8] sm:$0xf0]  ;;  %v1113_v49 = vld [vmem:[#allocation5 + $0x44] sm:$0xf]  ;;  %v1005_v56 = vld [vmem:[#allocation5 + $0x158] sm:$0xf0] }
  0x36   :  { %649 = vmatpush.bf16.msrb.mxu1 %v916_v55  ;;  %v1080_v48 = vor.u32 %v1165_v45, %v1077_v47  ;;  %v869_v50 = vld [vmem:[#allocation5 + $0x48] sm:$0xf0]  ;;  %v1129_v51 = vld [vmem:[#allocation5 + $0xc4] sm:$0xf]  ;;  %v1147_v55 = vld [vmem:[#allocation5 + $0x154] sm:$0xf] }
  0x37   :  { %662 = vmatpush.bf16.msrb.mxu2 %v980_v61  ;;  %v872_v52 = vor.u32 %v1113_v49, %v869_v50  ;;  %v933_v53 = vld [vmem:[#allocation5 + $0xc8] sm:$0xf0]  ;;  %v1163_v57 = vld [vmem:[#allocation5 + $0x1d4] sm:$0xf]  ;;  %v1008_v58 = vor.u32 %v1147_v55, %v1005_v56  ;;  %v1069_v59 = vld [vmem:[#allocation5 + $0x1d8] sm:$0xf0] }
  0x38   :  { %675 = vmatpush.bf16.msrb.mxu3 %v1044_v0  ;;  %v936_v54 = vor.u32 %v1129_v51, %v933_v53  ;;  %v1072_v60 = vor.u32 %v1163_v57, %v1069_v59  ;;  %v1111_v61 = vld [vmem:[#allocation5 + $0x34] sm:$0xf]  ;;  %v861_v62 = vld [vmem:[#allocation5 + $0x38] sm:$0xf0]  ;;  %v1145_v3 = vld [vmem:[#allocation5 + $0x144] sm:$0xf] }
  0x39   :  { %637 = vmatpush.bf16.msrb.mxu0 %v844_v63  ;;  %v1127_v63 = vld [vmem:[#allocation5 + $0xb4] sm:$0xf]  ;;  %v864_v0 = vor.u32 %v1111_v61, %v861_v62  ;;  %v925_v1 = vld [vmem:[#allocation5 + $0xb8] sm:$0xf0]  ;;  %v1161_v5 = vld [vmem:[#allocation5 + $0x1c4] sm:$0xf] }
  0x3a   :  { %650 = vmatpush.bf16.msrb.mxu1 %v908_v4  ;;  %v928_v2 = vor.u32 %v1127_v63, %v925_v1  ;;  %v997_v4 = vld [vmem:[#allocation5 + $0x148] sm:$0xf0]  ;;  %v1109_v8 = vld [vmem:[#allocation5 + $0x24] sm:$0xf]  ;;  %v989_v16 = vld [vmem:[#allocation5 + $0x138] sm:$0xf0] }
  0x3b   :  { %663 = vmatpush.bf16.msrb.mxu2 %v972_v13  ;;  %v1000_v6 = vor.u32 %v1145_v3, %v997_v4  ;;  %v1061_v7 = vld [vmem:[#allocation5 + $0x1c8] sm:$0xf0]  ;;  %v1125_v12 = vld [vmem:[#allocation5 + $0xa4] sm:$0xf]  ;;  %v1159_v17 = vld [vmem:[#allocation5 + $0x1b4] sm:$0xf] }
  0x3c   :  { %676 = vmatpush.bf16.msrb.mxu3 %v1036_v15  ;;  %v853_v9 = vld [vmem:[#allocation5 + $0x28] sm:$0xf0]  ;;  %v1064_v10 = vor.u32 %v1161_v5, %v1061_v7  ;;  %v1143_v15 = vld [vmem:[#allocation5 + $0x134] sm:$0xf]  ;;  %v1053_v19 = vld [vmem:[#allocation5 + $0x1b8] sm:$0xf0] }
  0x3d   :  { %638 = vmatpush.bf16.msrb.mxu0 %v836_v14  ;;  %v856_v11 = vor.u32 %v1109_v8, %v853_v9  ;;  %v917_v13 = vld [vmem:[#allocation5 + $0xa8] sm:$0xf0]  ;;  %v992_v18 = vor.u32 %v1143_v15, %v989_v16  ;;  %v845_v22 = vld [vmem:[#allocation5 + $0x18] sm:$0xf0]  ;;  %v1123_v23 = vld [vmem:[#allocation5 + $0x94] sm:$0xf] }
  0x3e   :  { %651 = vmatpush.bf16.msrb.mxu1 %v900_v20  ;;  %v920_v14 = vor.u32 %v1125_v12, %v917_v13  ;;  %v1056_v20 = vor.u32 %v1159_v17, %v1053_v19  ;;  %v1141_v26 = vld [vmem:[#allocation5 + $0x124] sm:$0xf]  ;;  %v981_v27 = vld [vmem:[#allocation5 + $0x128] sm:$0xf0]  ;;  %v1139_v39 = vld [vmem:[#allocation5 + $0x114] sm:$0xf] }
  0x3f   :  { %664 = vmatpush.bf16.msrb.mxu2 %v964_v31  ;;  %v984_v29 = vor.u32 %v1141_v26, %v981_v27  ;;  %v1157_v30 = vld [vmem:[#allocation5 + $0x1a4] sm:$0xf]  ;;  %v1045_v31 = vld [vmem:[#allocation5 + $0x1a8] sm:$0xf0]  ;;  %v1155_v41 = vld [vmem:[#allocation5 + $0x194] sm:$0xf] }
  0x40   :  { %677 = vmatpush.bf16.msrb.mxu3 %v1028_v32  ;;  %v1105_v32 = vld [vmem:[#allocation5 + $0x4] sm:$0xf]  ;;  %v1037_v43 = vld [vmem:[#allocation5 + $0x198] sm:$0xf0]  ;;  %v1029_v50 = vld [vmem:[#allocation5 + $0x188] sm:$0xf0] }
  0x41   :  { %683 = vmatpush.bf16.msra.mxu0 %v896_v21  ;;  %v1107_v21 = vld [vmem:[#allocation5 + $0x14] sm:$0xf]  ;;  %v1040_v44 = vor.u32 %v1155_v41, %v1037_v43  ;;  %v1137_v45 = vld [vmem:[#allocation5 + $0x104] sm:$0xf]  ;;  %v305_v19 = vld [vmem:[%s1306_s4] sm:$0x3] }
  0x42   :  { %696 = vmatpush.bf16.msra.mxu1 %v960_v25  ;;  %v848_v24 = vor.u32 %v1107_v21, %v845_v22  ;;  %v909_v25 = vld [vmem:[#allocation5 + $0x98] sm:$0xf0]  ;;  %v1153_v47 = vld [vmem:[#allocation5 + $0x184] sm:$0xf]  ;;  %v307_v21 = vperm.slane %v305_v19, 0  ;;  %vm757_vm7 = vcmask 7168  }
  0x43   :  { %709 = vmatpush.bf16.msra.mxu2 %v1024_v33  ;;  %v912_v28 = vor.u32 %v1123_v23, %v909_v25  ;;  %v1048_v33 = vor.u32 %v1157_v30, %v1045_v31  ;;  %v1032_v51 = vor.u32 %v1153_v47, %v1029_v50  ;;  %v741_v41 = vld [vmem:[%s1307_s5] sm:$0x3] }
  0x44   :  { %722 = vmatpush.bf16.msra.mxu3 %v1088_v35  ;;  %v1121_v35 = vld [vmem:[#allocation5 + $0x84] sm:$0xf]  ;;  %v743_v43 = vperm.slane %v741_v41, 0 }
  0x45   :  { %684 = vmatpush.bf16.msra.mxu0 %v888_v34  ;;  %v837_v34 = vld [vmem:[#allocation5 + $0x8] sm:$0xf0] }
  0x46   :  { %697 = vmatpush.bf16.msra.mxu1 %v952_v36  ;;  %v901_v36 = vld [vmem:[#allocation5 + $0x88] sm:$0xf0]  ;;  %v840_v37 = vor.u32 %v1105_v32, %v837_v34 }
  0x47   :  { %710 = vmatpush.bf16.msra.mxu2 %v1016_v46  ;;  %v904_v38 = vor.u32 %v1121_v35, %v901_v36  ;;  %v965_v46 = vld [vmem:[#allocation5 + $0x108] sm:$0xf0] }
  0x48   :  { %723 = vmatpush.bf16.msra.mxu3 %v1080_v48  ;;  %v79_v48 = vld [vmem:[%s1304_s2] sm:$0xf]  ;;  %v968_v49 = vor.u32 %v1137_v45, %v965_v46 }
  0x49   :  { %685 = vmatpush.bf16.msra.mxu0 %v880_v40  ;;  %v973_v40 = vld [vmem:[#allocation5 + $0x118] sm:$0xf0]  ;;  %v82_v53 = vperm.slane %v79_v48, 1  ;;  %v84_v61 = vperm.slane %v79_v48, 3 }
  0x4a   :  { %698 = vmatpush.bf16.msra.mxu1 %v944_v42  ;;  %v976_v42 = vor.u32 %v1139_v39, %v973_v40 }
  0x4b   :  { %711 = vmatpush.bf16.msra.mxu2 %v1008_v58 }
  0x4c   :  { %724 = vmatpush.bf16.msra.mxu3 %v1072_v60  ;;  %v83_v60 = vperm.slane %v79_v48, 2 }
  0x4d   :  { %686 = vmatpush.bf16.msra.mxu0 %v872_v52  ;;  %v81_v52 = vperm.slane %v79_v48, 0 }
  0x4e   :  { %699 = vmatpush.bf16.msra.mxu1 %v936_v54 }
  0x4f   :  { %712 = vmatpush.bf16.msra.mxu2 %v1000_v6 }
  0x50   :  { %725 = vmatpush.bf16.msra.mxu3 %v1064_v10 }
  0x51   :  { %687 = vmatpush.bf16.msra.mxu0 %v864_v0 }
  0x52   :  { %700 = vmatpush.bf16.msra.mxu1 %v928_v2 }
  0x53   :  { %713 = vmatpush.bf16.msra.mxu2 %v992_v18 }
  0x54   :  { %726 = vmatpush.bf16.msra.mxu3 %v1056_v20 }
  0x55   :  { %688 = vmatpush.bf16.msra.mxu0 %v856_v11 }
  0x56   :  { %701 = vmatpush.bf16.msra.mxu1 %v920_v14 }
  0x57   :  { %714 = vmatpush.bf16.msra.mxu2 %v984_v29 }
  0x58   :  { %727 = vmatpush.bf16.msra.mxu3 %v1048_v33 }
  0x59   :  { %689 = vmatpush.bf16.msra.mxu0 %v848_v24 }
  0x5a   :  { %702 = vmatpush.bf16.msra.mxu1 %v912_v28  ;;  %v308_v28 = vperm.slane %v305_v19, 1 }
  0x5b   :  { %715 = vmatpush.bf16.msra.mxu2 %v976_v42 }
  0x5c   :  { %728 = vmatpush.bf16.msra.mxu3 %v1040_v44  ;;  %v744_v44 = vperm.slane %v741_v41, 1 }
  0x5d   :  { %690 = vmatpush.bf16.msra.mxu0 %v840_v37 }
  0x5e   :  { %703 = vmatpush.bf16.msra.mxu1 %v904_v38 }
  0x5f   :  { %716 = vmatpush.bf16.msra.mxu2 %v968_v49 }
  0x60   :  { %729 = vmatpush.bf16.msra.mxu3 %v1032_v51 }
  0x9d   :  { %v182_v54 = vpop.f32.mrf.mxu0 }
  0x9e   :  { %v183_v55 = vadd.f32 %v182_v54, %v81_v52  ;;  %v195_v56 = vpop.f32.mrf.mxu1 }
  0x9f   :  { %v196_v57 = vadd.f32 %v195_v56, %v82_v53  ;;  %v1175_v53 = vld [vmem:[#allocation2] ss:$0 sm:$0xff] }
  0xa0   :  { %vm225_vm1 = vcmp.gt.f32.partialorder %v183_v55, 0.0  ;;  %v229_v58 = vmul.f32 0.1, %v183_v55 }
  0xa1   :  { %vm226_vm2 = vcmp.gt.f32.partialorder %v196_v57, 0.0  ;;  %v230_v59 = vmul.f32 0.1, %v196_v57 }
  0xa2   :  { %v233_v62 = vsel %vm225_vm1, %v183_v55, %v229_v58 }
  0xa3   :  { %v237_v63 = vpack.c.bf16 %v233_v62, %v233_v62  ;;  %v234_v0 = vsel %vm226_vm2, %v196_v57, %v230_v59 }
  0xa4   :  { %v238_v2 = vpack.c.bf16 %v234_v0, %v234_v0 }
  0xa5   :  { %v208_v1 = vpop.f32.mrf.mxu2  ;;  %v184_v5 = vpop.f32.mrf.mxu0  ;;  %639 = vmatmul.bf16.vlgmr.msrb.gmra.mxu0 %v237_v63 }
  0xa6   :  { %v209_v3 = vadd.f32 %v208_v1, %v83_v60  ;;  %v221_v4 = vpop.f32.mrf.mxu3  ;;  %652 = vmatmul.bf16.vlgmr.msrb.gmra.mxu1 %v238_v2  ;;  %v197_v7 = vpop.f32.mrf.mxu1 }
  0xa7   :  { %v222_v6 = vadd.f32 %v221_v4, %v84_v61 }
  0xa8   :  { %vm227_vm3 = vcmp.gt.f32.partialorder %v209_v3, 0.0  ;;  %v231_v8 = vmul.f32 0.1, %v209_v3 }
  0xa9   :  { %vm228_vm4 = vcmp.gt.f32.partialorder %v222_v6, 0.0  ;;  %v232_v9 = vmul.f32 0.1, %v222_v6 }
  0xaa   :  { %v235_v10 = vsel %vm227_vm3, %v209_v3, %v231_v8 }
  0xab   :  { %v239_v11 = vpack.c.bf16 %v235_v10, %v235_v10  ;;  %v236_v12 = vsel %vm228_vm4, %v222_v6, %v232_v9 }
  0xac   :  { %v240_v13 = vpack.c.bf16 %v236_v12, %v236_v12 }
  0xad   :  { %v210_v14 = vpop.f32.mrf.mxu2  ;;  %665 = vmatmul.bf16.vlgmr.msrb.gmra.mxu2 %v239_v11 }
  0xae   :  { %v223_v15 = vpop.f32.mrf.mxu3  ;;  %678 = vmatmul.bf16.vlgmr.msrb.gmra.mxu3 %v240_v13 }
  0xb5   :  { %691 = vmatmul.bf16.vlgmr.msra.gmra.mxu0 %v237_v63 }
  0xb6   :  { %704 = vmatmul.bf16.vlgmr.msra.gmra.mxu1 %v238_v2 }
  0xbd   :  { %717 = vmatmul.bf16.vlgmr.msra.gmra.mxu2 %v239_v11 }
  0xbe   :  { %730 = vmatmul.bf16.vlgmr.msra.gmra.mxu3 %v240_v13 }
 0x122   :  { %v640_v16 = vpop.f32.mrf.mxu0 }
 0x123   :  { %v653_v17 = vpop.f32.mrf.mxu1  ;;  %v641_v24 = vadd.f32 %v640_v16, %v307_v21 }
 0x125   :  { %v654_v27 = vadd.f32 %v653_v17, %v641_v24 }
 0x12a   :  { %v642_v18 = vpop.f32.mrf.mxu0 }
 0x12b   :  { %v655_v20 = vpop.f32.mrf.mxu1 }
 0x130   :  { %v666_v22 = vpop.f32.mrf.mxu2 }
 0x131   :  { %v679_v23 = vpop.f32.mrf.mxu3  ;;  %v667_v30 = vadd.f32 %v666_v22, %v654_v27 }
 0x132   :  { %v692_v25 = vpop.f32.mrf.mxu0 }
 0x133   :  { %v705_v26 = vpop.f32.mrf.mxu1  ;;  %v693_v32 = vadd.f32 %v692_v25, %v308_v28  ;;  %v680_v35 = vadd.f32 %v679_v23, %v667_v30 }
 0x135   :  { %v706_v36 = vadd.f32 %v705_v26, %v693_v32  ;;  %v737_v38 = vmul.f32 0.1, %v680_v35  ;;  %vm735_vm5 = vcmp.gt.f32.partialorder %v680_v35, 0.0 }
 0x137   :  { %v739_v46 = vsel %vm735_vm5, %v680_v35, %v737_v38 }
 0x138   :  { %v668_v29 = vpop.f32.mrf.mxu2  ;;  %v747_v49 = vmul.f32 %v743_v43, %v739_v46 }
 0x139   :  { %v681_v31 = vpop.f32.mrf.mxu3 }
 0x13a   :  { %v694_v33 = vpop.f32.mrf.mxu0 }
 0x13b   :  { %v707_v34 = vpop.f32.mrf.mxu1 }
 0x140   :  { %v718_v37 = vpop.f32.mrf.mxu2 }
 0x141   :  { %v719_v39 = vadd.f32 %v718_v37, %v706_v36  ;;  %v731_v40 = vpop.f32.mrf.mxu3 }
 0x143   :  { %v732_v42 = vadd.f32 %v731_v40, %v719_v39 }
 0x145   :  { %vm736_vm6 = vcmp.gt.f32.partialorder %v732_v42, 0.0  ;;  %v738_v45 = vmul.f32 0.1, %v732_v42 }
 0x147   :  { %v740_v47 = vsel %vm736_vm6, %v732_v42, %v738_v45 }
 0x148   :  { %v720_v48 = vpop.f32.mrf.mxu2  ;;  %v748_v50 = vmul.f32 %v744_v44, %v740_v47 }
 0x149   :  { %v733_v51 = vpop.f32.mrf.mxu3 }
 0x14a   :  { %v749_v52 = vadd.f32 %v748_v50, %v747_v49 }
 0x14c   :  { %750 = vadd.xlane.f32.xlu0 %v749_v52 }
 0x1bf   :  { %v751_v54 = vpop.xlane.xlu0 %750 }
 0x1c0   :  { %v756_v55 = vadd.f32 %v1175_v53, %v751_v54 }
 0x1c2   :  { %758 = vst.msk [vmem:[%s1309_s7] sm:$0xff] %vm757_vm7, %v756_v55 }
 0x1c3   :  { %763 = vsyncpa [#allocation4], 1 }
 0x1c4   :  { %764 = vsyncpa [#allocation6], 1 }

</bundles_post_ra>
